<compile_context>
chip_gen: v7x
topology: tpu7x:2x2x1
jax: 0.10.0
libtpu: 0.0.40
codegen_flags: <defaults>
</compile_context>

<pallas_src>
import functools

import jax
import jax.numpy as jnp
from jax.experimental import pallas as pl
from jax.experimental.pallas import tpu as pltpu

BN_EPS = 1e-5


def _round_up(x, m):
    return (x + m - 1) // m * m


# ---------------------------------------------------------------------------
# Pass 1: tiled matmul + streaming per-channel BN statistics.
# ---------------------------------------------------------------------------
def _matmul_stats_kernel(p_ref, w_ref, y_ref, stats_ref):
    # p_ref: (tm, Kd_pad) bf16 patches     w_ref: (Kd_pad, tc) bf16 weights
    # y_ref: (tm, tc) f32 pre-BN output    stats_ref: (2, tc) resident accumulator
    y = jnp.dot(p_ref[...], w_ref[...], preferred_element_type=jnp.float32)
    y_ref[...] = y

    part = jnp.concatenate(
        [jnp.sum(y, axis=0, keepdims=True),
         jnp.sum(y * y, axis=0, keepdims=True)], axis=0)  # (2, tc)

    @pl.when(pl.program_id(1) == 0)
    def _():
        stats_ref[...] = jnp.zeros_like(stats_ref)

    stats_ref[...] += part


# ---------------------------------------------------------------------------
# Pass 2: normalize + affine (+ ReLU), fully elementwise per tile.
# ---------------------------------------------------------------------------
def _bn_act_kernel(y_ref, scale_ref, shift_ref, o_ref, *, apply_relu):
    out = y_ref[...] * scale_ref[...] + shift_ref[...]
    if apply_relu:
        out = jnp.maximum(out, 0.0)
    o_ref[...] = out.astype(o_ref.dtype)


def _im2col_nchw(x, K, stride, pad):
    # x: (N, C, H, W) -> (N*Ho*Wo, C*K*K), ordering matches flattened (Cin, kH, kW)
    N, C, H, W = x.shape
    xp = jnp.pad(x, ((0, 0), (0, 0), (pad, pad), (pad, pad)))
    Ho = (H + 2 * pad - K) // stride + 1
    Wo = (W + 2 * pad - K) // stride + 1
    cols = []
    for ki in range(K):
        for kj in range(K):
            patch = xp[:, :, ki:ki + stride * Ho:stride, kj:kj + stride * Wo:stride]
            cols.append(patch)  # (N, C, Ho, Wo)
    col = jnp.stack(cols, axis=2)                       # (N, C, K*K, Ho, Wo)
    col = col.transpose(0, 3, 4, 1, 2)                  # (N, Ho, Wo, C, K*K)
    col = col.reshape(N * Ho * Wo, C * K * K)
    return col, Ho, Wo


@functools.partial(jax.jit, static_argnames=("kernel_size", "stride", "padding", "activation"))
def conv_block_forward(x, weight, bias, gamma, beta, *,
                       kernel_size, stride, padding, activation=True):
    """x: (N, Cin, H, W) f32; weight: (Cout, Cin, K, K); bias/gamma/beta: (Cout,)."""
    # Conv bias is a per-channel constant; training-mode BN subtracts the batch
    # mean immediately afterwards, so it cancels exactly -> drop it (saves one
    # broadcast-add over (M, Cout) and one input DMA).
    del bias

    N, Cin, H, W = x.shape
    Cout = weight.shape[0]
    K = kernel_size

    patches, Ho, Wo = _im2col_nchw(x, K, stride, padding)   # (M, Kd) f32
    M, Kd = patches.shape

    # Tile sizes: lane-dense channels (128), 8-aligned row tiles up to 512.
    # VMEM/step ~ 2*(tm*Kd_pad*2 + Kd_pad*TC*2 + tm*TC*4) bytes -- well under the
    # 24-32 MiB budget (v7x-safe) even for Kd up to several thousand.
    TC = 128
    tm = min(512, _round_up(M, 8))
    M_pad = _round_up(M, tm)
    Kd_pad = _round_up(Kd, 128)
    Cout_pad = _round_up(Cout, TC)
    n_m = M_pad // tm
    n_c = Cout_pad // TC

    # Zero padding keeps the padded rows/columns exact zeros (no bias), so the
    # streamed sum / sum-of-squares divided by the true M give exact batch stats.
    patches_p = jnp.pad(patches, ((0, M_pad - M), (0, Kd_pad - Kd))).astype(jnp.bfloat16)
    w2d = weight.reshape(Cout, Cin * K * K).T               # (Kd, Cout)
    w_p = jnp.pad(w2d, ((0, Kd_pad - Kd), (0, Cout_pad - Cout))).astype(jnp.bfloat16)

    cost1 = pl.CostEstimate(
        flops=2 * M_pad * Kd_pad * Cout_pad,
        transcendentals=0,
        bytes_accessed=M_pad * Kd_pad * 2 + Kd_pad * Cout_pad * 2 + M_pad * Cout_pad * 4)

    y, stats = pl.pallas_call(
        _matmul_stats_kernel,
        out_shape=(jax.ShapeDtypeStruct((M_pad, Cout_pad), jnp.float32),
                   jax.ShapeDtypeStruct((2, Cout_pad), jnp.float32)),
        grid_spec=pltpu.PrefetchScalarGridSpec(
            num_scalar_prefetch=0,
            grid=(n_c, n_m),                                    # stats-reduction axis (M) last
            in_specs=[
                pl.BlockSpec((tm, Kd_pad), lambda c, m: (m, 0)),
                pl.BlockSpec((Kd_pad, TC), lambda c, m: (0, c)),
            ],
            out_specs=[
                pl.BlockSpec((tm, TC), lambda c, m: (m, c)),
                pl.BlockSpec((2, TC), lambda c, m: (0, c)),     # resident across M
            ],
        ),
        compiler_params=pltpu.CompilerParams(
            dimension_semantics=("parallel", "arbitrary"),
            vmem_limit_bytes=32 * 1024 * 1024),
        cost_estimate=cost1,
    )(patches_p, w_p)

    # Fold batch stats + affine params into per-channel scale/shift (tiny XLA math).
    inv_m = 1.0 / float(M)
    mean = stats[0] * inv_m
    var = jnp.maximum(stats[1] * inv_m - mean * mean, 0.0)
    gamma_p = jnp.pad(gamma, (0, Cout_pad - Cout))
    beta_p = jnp.pad(beta, (0, Cout_pad - Cout))
    g_rstd = gamma_p * jax.lax.rsqrt(var + BN_EPS)
    scale = g_rstd.reshape(1, Cout_pad)
    shift = (beta_p - mean * g_rstd).reshape(1, Cout_pad)

    cost2 = pl.CostEstimate(
        flops=3 * M_pad * Cout_pad,
        transcendentals=0,
        bytes_accessed=2 * M_pad * Cout_pad * 4)

    out2d = pl.pallas_call(
        functools.partial(_bn_act_kernel, apply_relu=activation),
        out_shape=jax.ShapeDtypeStruct((M_pad, Cout_pad), jnp.float32),
        grid_spec=pltpu.PrefetchScalarGridSpec(
            num_scalar_prefetch=0,
            grid=(n_c, n_m),
            in_specs=[
                pl.BlockSpec((tm, TC), lambda c, m: (m, c)),
                pl.BlockSpec((1, TC), lambda c, m: (0, c)),
                pl.BlockSpec((1, TC), lambda c, m: (0, c)),
            ],
            out_specs=pl.BlockSpec((tm, TC), lambda c, m: (m, c)),
        ),
        compiler_params=pltpu.CompilerParams(
            dimension_semantics=("parallel", "parallel"),
            vmem_limit_bytes=32 * 1024 * 1024),
        cost_estimate=cost2,
    )(y, scale, shift)

    # TODO(synk): the NCHW transpose is an extra HBM pass kept only to match the
    # PyTorch module's layout; drop it if the downstream consumer takes NHWC.
    out = out2d[:M, :Cout].reshape(N, Ho, Wo, Cout).transpose(0, 3, 1, 2)
    return out


def _reference(x, weight, bias, gamma, beta, kernel_size, stride, padding, *,
               matmul_dtype=jnp.float32, activation=True):
    # Pure-JAX reference (PyTorch semantics: conv+bias -> train-mode BN -> ReLU).
    patches, Ho, Wo = _im2col_nchw(x, kernel_size, stride, padding)
    N = x.shape[0]
    Cout = weight.shape[0]
    w2d = weight.reshape(Cout, -1).T
    y = jnp.dot(patches.astype(matmul_dtype), w2d.astype(matmul_dtype),
                preferred_element_type=jnp.float32) + bias[None, :]
    mean = y.mean(axis=0, keepdims=True)
    var = jnp.maximum((y * y).mean(axis=0, keepdims=True) - mean * mean, 0.0)
    y = (y - mean) * jax.lax.rsqrt(var + BN_EPS) * gamma[None, :] + beta[None, :]
    if activation:
        y = jnp.maximum(y, 0.0)
    return y.reshape(N, Ho, Wo, Cout).transpose(0, 3, 1, 2)


if __name__ == "__main__":
    # Small shapes consistent with the module: batch=2, in_channels=4, spatial=16.
    N, Cin, H, W = 2, 4, 16, 16
    Cout, K, stride, padding = 8, 3, 1, 1

    key = jax.random.PRNGKey(0)
    kx, kw = jax.random.split(key)

    x = jax.random.normal(kx, (N, Cin, H, W), dtype=jnp.float32)

    # Deterministic parameter init, matching initializeConv:
    #   weight ~ N(0, sqrt(2 / (K^2 * out_channels))), bias = 0
    init_std = jnp.sqrt(2.0 / (K * K * Cout))
    weight = init_std * jax.random.normal(kw, (Cout, Cin, K, K), dtype=jnp.float32)
    bias = jnp.zeros((Cout,), dtype=jnp.float32)
    # BatchNorm2d default affine params.
    gamma = jnp.ones((Cout,), dtype=jnp.float32)
    beta = jnp.zeros((Cout,), dtype=jnp.float32)

    out = conv_block_forward(x, weight, bias, gamma, beta,
                             kernel_size=K, stride=stride, padding=padding,
                             activation=True)
    out = jax.block_until_ready(out)
    assert out.shape == (N, Cout, H, W), out.shape

    # Kernel uses bf16 MXU operands with f32 accumulation: match that path tightly,
    # and the pure-f32 module semantics with a bf16-rounding-sized tolerance.
    ref_bf16 = _reference(x, weight, bias, gamma, beta, K, stride, padding,
                          matmul_dtype=jnp.bfloat16, activation=True)
    ref_f32 = _reference(x, weight, bias, gamma, beta, K, stride, padding,
                         matmul_dtype=jnp.float32, activation=True)
    assert jnp.allclose(out, ref_bf16, atol=1e-4, rtol=1e-4), \
        float(jnp.max(jnp.abs(out - ref_bf16)))
    assert jnp.allclose(out, ref_f32, atol=3e-2, rtol=3e-2), \
        float(jnp.max(jnp.abs(out - ref_f32)))

    print("KERNEL_OK")
</pallas_src>

<mosaic_0001>
module attributes {stable_mosaic.version = 11 : i64} {
  func.func @_bn_act_kernel(%arg0: i32, %arg1: i32, %arg2: memref<512x128xf32, #tpu.memory_space<vmem>>, %arg3: memref<1x128xf32, #tpu.memory_space<vmem>>, %arg4: memref<1x128xf32, #tpu.memory_space<vmem>>, %arg5: memref<512x128xf32, #tpu.memory_space<vmem>>) attributes {dimension_semantics = [#tpu.dimension_semantics<parallel>, #tpu.dimension_semantics<parallel>], iteration_bounds = array<i64: 1, 1>, scalar_prefetch = 0 : i64, scratch_operands = 0 : i64, tpu.core_type = #tpu.core_type<tc>, window_params = [{transform_indices = @transform_0, window_bounds = array<i64: 512, 128>}, {transform_indices = @transform_1, window_bounds = array<i64: 1, 128>}, {transform_indices = @transform_2, window_bounds = array<i64: 1, 128>}, {transform_indices = @transform_3, window_bounds = array<i64: 512, 128>}]} {
    %c0 = arith.constant 0 : index
    %c0_0 = arith.constant 0 : index
    %0 = vector.load %arg2[%c0, %c0_0] : memref<512x128xf32, #tpu.memory_space<vmem>>, vector<512x128xf32>
    %c0_1 = arith.constant 0 : index
    %c0_2 = arith.constant 0 : index
    %1 = vector.load %arg3[%c0_1, %c0_2] : memref<1x128xf32, #tpu.memory_space<vmem>>, vector<1x128xf32>
    %2 = vector.broadcast %1 : vector<1x128xf32> to vector<512x128xf32>
    %3 = arith.mulf %0, %2 : vector<512x128xf32>
    %c0_3 = arith.constant 0 : index
    %c0_4 = arith.constant 0 : index
    %4 = vector.load %arg4[%c0_3, %c0_4] : memref<1x128xf32, #tpu.memory_space<vmem>>, vector<1x128xf32>
    %5 = vector.broadcast %4 : vector<1x128xf32> to vector<512x128xf32>
    %6 = arith.addf %3, %5 : vector<512x128xf32>
    %cst = arith.constant 0.000000e+00 : f32
    %7 = vector.broadcast %cst : f32 to vector<512x128xf32>
    %8 = arith.maximumf %6, %7 : vector<512x128xf32>
    %c0_5 = arith.constant 0 : index
    %c0_6 = arith.constant 0 : index
    %9 = vector.load %arg5[%c0_5, %c0_6] : memref<512x128xf32, #tpu.memory_space<vmem>>, vector<512x128xf32>
    tpu.vector_store %arg5[%c0_5, %c0_6], %8 {strides = array<i32>} : memref<512x128xf32, #tpu.memory_space<vmem>>, vector<512x128xf32>,
    return
  }
  func.func @transform_0(%arg0: i32, %arg1: i32) -> (i32, i32) {
    %c0_i32 = arith.constant 0 : i32
    return %arg1, %arg0 : i32, i32
  }
  func.func @transform_1(%arg0: i32, %arg1: i32) -> (i32, i32) {
    %c0_i32 = arith.constant 0 : i32
    %c0_i32_0 = arith.constant 0 : i32
    return %c0_i32, %arg0 : i32, i32
  }
  func.func @transform_2(%arg0: i32, %arg1: i32) -> (i32, i32) {
    %c0_i32 = arith.constant 0 : i32
    %c0_i32_0 = arith.constant 0 : i32
    return %c0_i32, %arg0 : i32, i32
  }
  func.func @transform_3(%arg0: i32, %arg1: i32) -> (i32, i32) {
    %c0_i32 = arith.constant 0 : i32
    return %arg1, %arg0 : i32, i32
  }
}

module attributes {stable_mosaic.version = 11 : i64} {
  func.func @_matmul_stats_kernel(%arg0: i32, %arg1: i32, %arg2: memref<512x128xbf16, #tpu.memory_space<vmem>>, %arg3: memref<128x128xbf16, #tpu.memory_space<vmem>>, %arg4: memref<512x128xf32, #tpu.memory_space<vmem>>, %arg5: memref<2x128xf32, #tpu.memory_space<vmem>>) attributes {dimension_semantics = [#tpu.dimension_semantics<parallel>, #tpu.dimension_semantics<arbitrary>], iteration_bounds = array<i64: 1, 1>, scalar_prefetch = 0 : i64, scratch_operands = 0 : i64, tpu.core_type = #tpu.core_type<tc>, window_params = [{transform_indices = @transform_0, window_bounds = array<i64: 512, 128>}, {transform_indices = @transform_1, window_bounds = array<i64: 128, 128>}, {transform_indices = @transform_2, window_bounds = array<i64: 512, 128>}, {transform_indices = @transform_3, window_bounds = array<i64: 2, 128>}]} {
    %c0 = arith.constant 0 : index
    %c0_0 = arith.constant 0 : index
    %0 = vector.load %arg2[%c0, %c0_0] : memref<512x128xbf16, #tpu.memory_space<vmem>>, vector<512x128xbf16>
    %c0_1 = arith.constant 0 : index
    %c0_2 = arith.constant 0 : index
    %1 = vector.load %arg3[%c0_1, %c0_2] : memref<128x128xbf16, #tpu.memory_space<vmem>>, vector<128x128xbf16>
    %cst = arith.constant dense<0.000000e+00> : vector<512x128xf32>
    %2 = tpu.matmul %0, %1, %cst {dimension_numbers = #tpu.dot_dimension_numbers<[1], [0], [0], [1], [0, 0, 1, 1], [], []>} : vector<512x128xbf16>, vector<128x128xbf16>, vector<512x128xf32> -> vector<512x128xf32>
    %c0_3 = arith.constant 0 : index
    %c0_4 = arith.constant 0 : index
    %3 = vector.load %arg4[%c0_3, %c0_4] : memref<512x128xf32, #tpu.memory_space<vmem>>, vector<512x128xf32>
    tpu.vector_store %arg4[%c0_3, %c0_4], %2 {strides = array<i32>} : memref<512x128xf32, #tpu.memory_space<vmem>>, vector<512x128xf32>,
    %cst_5 = arith.constant dense<0.000000e+00> : vector<128xf32>
    %4 = vector.multi_reduction <add>, %2, %cst_5 [0] : vector<512x128xf32> to vector<128xf32>
    %5 = vector.shape_cast %4 : vector<128xf32> to vector<1x128xf32>
    %6 = arith.mulf %2, %2 : vector<512x128xf32>
    %cst_6 = arith.constant dense<0.000000e+00> : vector<128xf32>
    %7 = vector.multi_reduction <add>, %6, %cst_6 [0] : vector<512x128xf32> to vector<128xf32>
    %8 = vector.shape_cast %7 : vector<128xf32> to vector<1x128xf32>
    %9 = tpu.concatenate %5, %8 in 0 : vector<1x128xf32>, vector<1x128xf32> -> vector<2x128xf32>
    %c0_i32 = arith.constant 0 : i32
    %10 = arith.cmpi eq, %arg1, %c0_i32 : i32
    %11 = arith.extui %10 : i1 to i32
    %c0_i32_7 = arith.constant 0 : i32
    %12 = arith.cmpi ne, %11, %c0_i32_7 : i32
    scf.if %12 {
      %cst_12 = arith.constant 0.000000e+00 : f32
      %16 = vector.broadcast %cst_12 : f32 to vector<2x128xf32>
      %c0_13 = arith.constant 0 : index
      %c0_14 = arith.constant 0 : index
      %17 = vector.load %arg5[%c0_13, %c0_14] : memref<2x128xf32, #tpu.memory_space<vmem>>, vector<2x128xf32>
      tpu.vector_store %arg5[%c0_13, %c0_14], %16 {strides = array<i32>} : memref<2x128xf32, #tpu.memory_space<vmem>>, vector<2x128xf32>,
    } else {
    }
    %c0_8 = arith.constant 0 : index
    %c0_9 = arith.constant 0 : index
    %13 = vector.load %arg5[%c0_8, %c0_9] : memref<2x128xf32, #tpu.memory_space<vmem>>, vector<2x128xf32>
    %14 = arith.addf %13, %9 : vector<2x128xf32>
    %c0_10 = arith.constant 0 : index
    %c0_11 = arith.constant 0 : index
    %15 = vector.load %arg5[%c0_10, %c0_11] : memref<2x128xf32, #tpu.memory_space<vmem>>, vector<2x128xf32>
    tpu.vector_store %arg5[%c0_10, %c0_11], %14 {strides = array<i32>} : memref<2x128xf32, #tpu.memory_space<vmem>>, vector<2x128xf32>,
    return
  }
  func.func @transform_0(%arg0: i32, %arg1: i32) -> (i32, i32) {
    %c0_i32 = arith.constant 0 : i32
    %c0_i32_0 = arith.constant 0 : i32
    return %arg1, %c0_i32 : i32, i32
  }
  func.func @transform_1(%arg0: i32, %arg1: i32) -> (i32, i32) {
    %c0_i32 = arith.constant 0 : i32
    %c0_i32_0 = arith.constant 0 : i32
    return %c0_i32, %arg0 : i32, i32
  }
  func.func @transform_2(%arg0: i32, %arg1: i32) -> (i32, i32) {
    %c0_i32 = arith.constant 0 : i32
    return %arg1, %arg0 : i32, i32
  }
  func.func @transform_3(%arg0: i32, %arg1: i32) -> (i32, i32) {
    %c0_i32 = arith.constant 0 : i32
    %c0_i32_0 = arith.constant 0 : i32
    return %c0_i32, %arg0 : i32, i32
  }
}

</mosaic_0001>

<bundles_post_ra>
// kernel: conv_block_forward.3
= control target key start
LH: loop header
LB: loop body
LE: loop exit
PB: predicated region body
PF: predicated region fallthrough
CT: control target
= control target key end

     0   :  { %s896_s0 = inlined_call_operand.vmem [shape: f32[512,128], index: 0, kind: input, shape index: {}]   ;;  %s897_s1 = inlined_call_operand.vmem [shape: f32[1,128], index: 1, kind: input, shape index: {}]   ;;  %s898_s2 = inlined_call_operand.vmem [shape: f32[1,128], index: 2, kind: input, shape index: {}]   ;;  %s899_s3 = inlined_call_operand.vmem [shape: f32[512,128], index: 3, kind: output, shape index: {}]  }
   0x1   :  { %v14_v0 = vld [vmem:[%s896_s0] sm:$0xff]  ;;  %v15_v4 = vld [vmem:[%s896_s0 + $0x8] sm:$0xff]  ;;  %v16_v5 = vld [vmem:[%s896_s0 + $0x10] sm:$0xff] }
   0x2   :  { %v380_v1 = vld [vmem:[%s897_s1] ss:$0 sm:$0xff]  ;;  %v17_v6 = vld [vmem:[%s896_s0 + $0x18] sm:$0xff]  ;;  %v19_v11 = vld [vmem:[%s896_s0 + $0x28] sm:$0xff] }
   0x3   :  { %v385_v2 = vld [vmem:[%s898_s2] ss:$0 sm:$0xff]  ;;  %v85_v3 = vmul.f32 %v380_v1, %v14_v0  ;;  %v86_v7 = vmul.f32 %v380_v1, %v15_v4  ;;  %v87_v8 = vmul.f32 %v380_v1, %v16_v5  ;;  %v88_v9 = vmul.f32 %v380_v1, %v17_v6  ;;  %v20_v12 = vld [vmem:[%s896_s0 + $0x30] sm:$0xff]  ;;  %v21_v17 = vld [vmem:[%s896_s0 + $0x38] sm:$0xff] }
   0x4   :  { %v18_v10 = vld [vmem:[%s896_s0 + $0x20] sm:$0xff]  ;;  %v90_v15 = vmul.f32 %v380_v1, %v19_v11  ;;  %v91_v16 = vmul.f32 %v380_v1, %v20_v12  ;;  %v92_v21 = vmul.f32 %v380_v1, %v21_v17  ;;  %v23_v27 = vld [vmem:[%s896_s0 + $0x48] sm:$0xff]  ;;  %v24_v28 = vld [vmem:[%s896_s0 + $0x50] sm:$0xff] }
   0x5   :  { %v156_v13 = vadd.f32 %v385_v2, %v85_v3  ;;  %v89_v14 = vmul.f32 %v380_v1, %v18_v10  ;;  %v157_v18 = vadd.f32 %v385_v2, %v86_v7  ;;  %v158_v19 = vadd.f32 %v385_v2, %v87_v8  ;;  %v22_v22 = vld [vmem:[%s896_s0 + $0x40] sm:$0xff]  ;;  %v25_v29 = vld [vmem:[%s896_s0 + $0x58] sm:$0xff]  ;;  %v27_v35 = vld [vmem:[%s896_s0 + $0x68] sm:$0xff] }
   0x6   :  { %v159_v20 = vadd.f32 %v385_v2, %v88_v9  ;;  %v161_v25 = vadd.f32 %v385_v2, %v90_v15  ;;  %v162_v26 = vadd.f32 %v385_v2, %v91_v16  ;;  %v163_v33 = vadd.f32 %v385_v2, %v92_v21  ;;  %v26_v34 = vld [vmem:[%s896_s0 + $0x60] sm:$0xff]  ;;  %v28_v36 = vld [vmem:[%s896_s0 + $0x70] sm:$0xff]  ;;  %v29_v41 = vld [vmem:[%s896_s0 + $0x78] sm:$0xff] }
   0x7   :  { %v220_v23 = vmax.f32 %v156_v13, 0.0  ;;  %v160_v24 = vadd.f32 %v385_v2, %v89_v14  ;;  %v221_v30 = vmax.f32 %v157_v18, 0.0  ;;  %v222_v31 = vmax.f32 %v158_v19, 0.0  ;;  %v30_v54 = vld [vmem:[%s896_s0 + $0x80] sm:$0xff]  ;;  %v31_v59 = vld [vmem:[%s896_s0 + $0x88] sm:$0xff]  ;;  %v32_v60 = vld [vmem:[%s896_s0 + $0x90] sm:$0xff] }
   0x8   :  { %v223_v32 = vmax.f32 %v159_v20, 0.0  ;;  %v225_v38 = vmax.f32 %v161_v25, 0.0  ;;  %v226_v39 = vmax.f32 %v162_v26, 0.0  ;;  %v93_v40 = vmul.f32 %v380_v1, %v22_v22  ;;  %v33_v61 = vld [vmem:[%s896_s0 + $0x98] sm:$0xff]  ;;  %v34_v4 = vld [vmem:[%s896_s0 + $0xa0] sm:$0xff]  ;;  %v35_v5 = vld [vmem:[%s896_s0 + $0xa8] sm:$0xff] }
   0x9   :  { %284 = vst [vmem:[%s899_s3] sm:$0xff] %v220_v23  ;;  %v224_v37 = vmax.f32 %v160_v24, 0.0  ;;  %285 = vst [vmem:[%s899_s3 + $0x8] sm:$0xff] %v221_v30  ;;  %v227_v42 = vmax.f32 %v163_v33, 0.0  ;;  %v94_v43 = vmul.f32 %v380_v1, %v23_v27  ;;  %v95_v44 = vmul.f32 %v380_v1, %v24_v28  ;;  %v36_v6 = vld [vmem:[%s896_s0 + $0xb0] sm:$0xff]  ;;  %v37_v11 = vld [vmem:[%s896_s0 + $0xb8] sm:$0xff] }
   0xa   :  { %286 = vst [vmem:[%s899_s3 + $0x10] sm:$0xff] %v222_v31  ;;  %287 = vst [vmem:[%s899_s3 + $0x18] sm:$0xff] %v223_v32  ;;  %v96_v45 = vmul.f32 %v380_v1, %v25_v29  ;;  %v164_v46 = vadd.f32 %v385_v2, %v93_v40  ;;  %v97_v47 = vmul.f32 %v380_v1, %v26_v34  ;;  %v38_v24 = vld [vmem:[%s896_s0 + $0xc0] sm:$0xff]  ;;  %v39_v29 = vld [vmem:[%s896_s0 + $0xc8] sm:$0xff] }
   0xb   :  { %288 = vst [vmem:[%s899_s3 + $0x20] sm:$0xff] %v224_v37  ;;  %289 = vst [vmem:[%s899_s3 + $0x28] sm:$0xff] %v225_v38  ;;  %v98_v48 = vmul.f32 %v380_v1, %v27_v35  ;;  %v99_v49 = vmul.f32 %v380_v1, %v28_v36  ;;  %v165_v50 = vadd.f32 %v385_v2, %v94_v43  ;;  %v40_v30 = vld [vmem:[%s896_s0 + $0xd0] sm:$0xff]  ;;  %v41_v31 = vld [vmem:[%s896_s0 + $0xd8] sm:$0xff] }
   0xc   :  { %290 = vst [vmem:[%s899_s3 + $0x30] sm:$0xff] %v226_v39  ;;  %291 = vst [vmem:[%s899_s3 + $0x38] sm:$0xff] %v227_v42  ;;  %v166_v51 = vadd.f32 %v385_v2, %v95_v44  ;;  %v167_v52 = vadd.f32 %v385_v2, %v96_v45  ;;  %v100_v53 = vmul.f32 %v380_v1, %v29_v41  ;;  %v228_v55 = vmax.f32 %v164_v46, 0.0  ;;  %v42_v36 = vld [vmem:[%s896_s0 + $0xe0] sm:$0xff]  ;;  %v43_v37 = vld [vmem:[%s896_s0 + $0xe8] sm:$0xff] }
   0xd   :  { %v168_v56 = vadd.f32 %v385_v2, %v97_v47  ;;  %v169_v57 = vadd.f32 %v385_v2, %v98_v48  ;;  %v170_v58 = vadd.f32 %v385_v2, %v99_v49  ;;  %v229_v62 = vmax.f32 %v165_v50, 0.0  ;;  %v44_v38 = vld [vmem:[%s896_s0 + $0xf0] sm:$0xff]  ;;  %v45_v43 = vld [vmem:[%s896_s0 + $0xf8] sm:$0xff] }
   0xe   :  { %v230_v63 = vmax.f32 %v166_v51, 0.0  ;;  %v231_v0 = vmax.f32 %v167_v52, 0.0  ;;  %v171_v3 = vadd.f32 %v385_v2, %v100_v53  ;;  %292 = vst [vmem:[%s899_s3 + $0x40] sm:$0xff] %v228_v55  ;;  %v101_v10 = vmul.f32 %v380_v1, %v30_v54 }
   0xf   :  { %v232_v7 = vmax.f32 %v168_v56, 0.0  ;;  %v233_v8 = vmax.f32 %v169_v57, 0.0  ;;  %v234_v9 = vmax.f32 %v170_v58, 0.0  ;;  %293 = vst [vmem:[%s899_s3 + $0x48] sm:$0xff] %v229_v62  ;;  %v102_v13 = vmul.f32 %v380_v1, %v31_v59  ;;  %v46_v56 = vld [vmem:[%s896_s0 + $0x100] sm:$0xff]  ;;  %v48_v62 = vld [vmem:[%s896_s0 + $0x110] sm:$0xff] }
  0x10   :  { %294 = vst [vmem:[%s899_s3 + $0x50] sm:$0xff] %v230_v63  ;;  %295 = vst [vmem:[%s899_s3 + $0x58] sm:$0xff] %v231_v0  ;;  %v235_v12 = vmax.f32 %v171_v3, 0.0  ;;  %v103_v14 = vmul.f32 %v380_v1, %v32_v60  ;;  %v104_v15 = vmul.f32 %v380_v1, %v33_v61  ;;  %v172_v16 = vadd.f32 %v385_v2, %v101_v10  ;;  %v47_v61 = vld [vmem:[%s896_s0 + $0x108] sm:$0xff]  ;;  %v49_v63 = vld [vmem:[%s896_s0 + $0x118] sm:$0xff] }
  0x11   :  { %296 = vst [vmem:[%s899_s3 + $0x60] sm:$0xff] %v232_v7  ;;  %297 = vst [vmem:[%s899_s3 + $0x68] sm:$0xff] %v233_v8  ;;  %v105_v17 = vmul.f32 %v380_v1, %v34_v4  ;;  %v106_v18 = vmul.f32 %v380_v1, %v35_v5  ;;  %v107_v19 = vmul.f32 %v380_v1, %v36_v6  ;;  %v50_v6 = vld [vmem:[%s896_s0 + $0x120] sm:$0xff]  ;;  %v51_v7 = vld [vmem:[%s896_s0 + $0x128] sm:$0xff] }
  0x12   :  { %298 = vst [vmem:[%s899_s3 + $0x70] sm:$0xff] %v234_v9  ;;  %299 = vst [vmem:[%s899_s3 + $0x78] sm:$0xff] %v235_v12  ;;  %v173_v20 = vadd.f32 %v385_v2, %v102_v13  ;;  %v174_v21 = vadd.f32 %v385_v2, %v103_v14  ;;  %v175_v22 = vadd.f32 %v385_v2, %v104_v15  ;;  %v236_v25 = vmax.f32 %v172_v16, 0.0  ;;  %v52_v8 = vld [vmem:[%s896_s0 + $0x130] sm:$0xff]  ;;  %v53_v13 = vld [vmem:[%s896_s0 + $0x138] sm:$0xff] }
  0x13   :  { %v108_v23 = vmul.f32 %v380_v1, %v37_v11  ;;  %v176_v26 = vadd.f32 %v385_v2, %v105_v17  ;;  %v177_v27 = vadd.f32 %v385_v2, %v106_v18  ;;  %v178_v28 = vadd.f32 %v385_v2, %v107_v19 }
  0x14   :  { %v237_v32 = vmax.f32 %v173_v20, 0.0  ;;  %v238_v33 = vmax.f32 %v174_v21, 0.0  ;;  %v239_v34 = vmax.f32 %v175_v22, 0.0  ;;  %300 = vst [vmem:[%s899_s3 + $0x80] sm:$0xff] %v236_v25  ;;  %v109_v42 = vmul.f32 %v380_v1, %v38_v24 }
  0x15   :  { %v179_v35 = vadd.f32 %v385_v2, %v108_v23  ;;  %v240_v39 = vmax.f32 %v176_v26, 0.0  ;;  %v241_v40 = vmax.f32 %v177_v27, 0.0  ;;  %v242_v41 = vmax.f32 %v178_v28, 0.0  ;;  %v54_v26 = vld [vmem:[%s896_s0 + $0x140] sm:$0xff] }
  0x16   :  { %301 = vst [vmem:[%s899_s3 + $0x88] sm:$0xff] %v237_v32  ;;  %302 = vst [vmem:[%s899_s3 + $0x90] sm:$0xff] %v238_v33  ;;  %v110_v45 = vmul.f32 %v380_v1, %v39_v29  ;;  %v111_v46 = vmul.f32 %v380_v1, %v40_v30  ;;  %v112_v47 = vmul.f32 %v380_v1, %v41_v31  ;;  %v55_v31 = vld [vmem:[%s896_s0 + $0x148] sm:$0xff]  ;;  %v56_v32 = vld [vmem:[%s896_s0 + $0x150] sm:$0xff] }
  0x17   :  { %303 = vst [vmem:[%s899_s3 + $0x98] sm:$0xff] %v239_v34  ;;  %v243_v44 = vmax.f32 %v179_v35, 0.0  ;;  %304 = vst [vmem:[%s899_s3 + $0xa0] sm:$0xff] %v240_v39  ;;  %v180_v48 = vadd.f32 %v385_v2, %v109_v42  ;;  %v113_v49 = vmul.f32 %v380_v1, %v42_v36  ;;  %v114_v50 = vmul.f32 %v380_v1, %v43_v37  ;;  %v57_v33 = vld [vmem:[%s896_s0 + $0x158] sm:$0xff]  ;;  %v59_v39 = vld [vmem:[%s896_s0 + $0x168] sm:$0xff] }
  0x18   :  { %305 = vst [vmem:[%s899_s3 + $0xa8] sm:$0xff] %v241_v40  ;;  %306 = vst [vmem:[%s899_s3 + $0xb0] sm:$0xff] %v242_v41  ;;  %v115_v51 = vmul.f32 %v380_v1, %v44_v38  ;;  %v181_v52 = vadd.f32 %v385_v2, %v110_v45  ;;  %v182_v53 = vadd.f32 %v385_v2, %v111_v46  ;;  %v58_v38 = vld [vmem:[%s896_s0 + $0x160] sm:$0xff]  ;;  %v60_v40 = vld [vmem:[%s896_s0 + $0x170] sm:$0xff] }
  0x19   :  { %307 = vst [vmem:[%s899_s3 + $0xb8] sm:$0xff] %v243_v44  ;;  %v183_v54 = vadd.f32 %v385_v2, %v112_v47  ;;  %v116_v55 = vmul.f32 %v380_v1, %v45_v43  ;;  %v244_v57 = vmax.f32 %v180_v48, 0.0  ;;  %v184_v58 = vadd.f32 %v385_v2, %v113_v49  ;;  %v61_v45 = vld [vmem:[%s896_s0 + $0x178] sm:$0xff] }
  0x1a   :  { %v185_v59 = vadd.f32 %v385_v2, %v114_v50  ;;  %v186_v60 = vadd.f32 %v385_v2, %v115_v51  ;;  %v245_v0 = vmax.f32 %v181_v52, 0.0  ;;  %v246_v3 = vmax.f32 %v182_v53, 0.0 }
  0x1b   :  { %v247_v4 = vmax.f32 %v183_v54, 0.0  ;;  %v187_v5 = vadd.f32 %v385_v2, %v116_v55  ;;  %308 = vst [vmem:[%s899_s3 + $0xc0] sm:$0xff] %v244_v57  ;;  %v248_v9 = vmax.f32 %v184_v58, 0.0  ;;  %v117_v12 = vmul.f32 %v380_v1, %v46_v56  ;;  %v62_v58 = vld [vmem:[%s896_s0 + $0x180] sm:$0xff] }
  0x1c   :  { %v249_v10 = vmax.f32 %v185_v59, 0.0  ;;  %v250_v11 = vmax.f32 %v186_v60, 0.0  ;;  %309 = vst [vmem:[%s899_s3 + $0xc8] sm:$0xff] %v245_v0  ;;  %310 = vst [vmem:[%s899_s3 + $0xd0] sm:$0xff] %v246_v3  ;;  %v118_v15 = vmul.f32 %v380_v1, %v47_v61  ;;  %v119_v16 = vmul.f32 %v380_v1, %v48_v62  ;;  %v64_v0 = vld [vmem:[%s896_s0 + $0x190] sm:$0xff]  ;;  %v65_v3 = vld [vmem:[%s896_s0 + $0x198] sm:$0xff] }
  0x1d   :  { %311 = vst [vmem:[%s899_s3 + $0xd8] sm:$0xff] %v247_v4  ;;  %v251_v14 = vmax.f32 %v187_v5, 0.0  ;;  %v120_v17 = vmul.f32 %v380_v1, %v49_v63  ;;  %312 = vst [vmem:[%s899_s3 + $0xe0] sm:$0xff] %v248_v9  ;;  %v188_v18 = vadd.f32 %v385_v2, %v117_v12  ;;  %v121_v19 = vmul.f32 %v380_v1, %v50_v6  ;;  %v63_v63 = vld [vmem:[%s896_s0 + $0x188] sm:$0xff] }
  0x1e   :  { %313 = vst [vmem:[%s899_s3 + $0xe8] sm:$0xff] %v249_v10  ;;  %314 = vst [vmem:[%s899_s3 + $0xf0] sm:$0xff] %v250_v11  ;;  %v122_v20 = vmul.f32 %v380_v1, %v51_v7  ;;  %v123_v21 = vmul.f32 %v380_v1, %v52_v8  ;;  %v189_v22 = vadd.f32 %v385_v2, %v118_v15  ;;  %v66_v8 = vld [vmem:[%s896_s0 + $0x1a0] sm:$0xff]  ;;  %v67_v9 = vld [vmem:[%s896_s0 + $0x1a8] sm:$0xff] }
  0x1f   :  { %315 = vst [vmem:[%s899_s3 + $0xf8] sm:$0xff] %v251_v14  ;;  %v190_v23 = vadd.f32 %v385_v2, %v119_v16  ;;  %v191_v24 = vadd.f32 %v385_v2, %v120_v17  ;;  %v124_v25 = vmul.f32 %v380_v1, %v53_v13  ;;  %v252_v27 = vmax.f32 %v188_v18, 0.0  ;;  %v68_v10 = vld [vmem:[%s896_s0 + $0x1b0] sm:$0xff]  ;;  %v69_v15 = vld [vmem:[%s896_s0 + $0x1b8] sm:$0xff] }
  0x20   :  { %v192_v28 = vadd.f32 %v385_v2, %v121_v19  ;;  %v193_v29 = vadd.f32 %v385_v2, %v122_v20  ;;  %v194_v30 = vadd.f32 %v385_v2, %v123_v21  ;;  %v253_v34 = vmax.f32 %v189_v22, 0.0 }
  0x21   :  { %v254_v35 = vmax.f32 %v190_v23, 0.0  ;;  %v255_v36 = vmax.f32 %v191_v24, 0.0  ;;  %v195_v37 = vadd.f32 %v385_v2, %v124_v25  ;;  %316 = vst [vmem:[%s899_s3 + $0x100] sm:$0xff] %v252_v27  ;;  %v125_v44 = vmul.f32 %v380_v1, %v54_v26 }
  0x22   :  { %v256_v41 = vmax.f32 %v192_v28, 0.0  ;;  %v257_v42 = vmax.f32 %v193_v29, 0.0  ;;  %v258_v43 = vmax.f32 %v194_v30, 0.0  ;;  %317 = vst [vmem:[%s899_s3 + $0x108] sm:$0xff] %v253_v34  ;;  %v126_v47 = vmul.f32 %v380_v1, %v55_v31  ;;  %v70_v28 = vld [vmem:[%s896_s0 + $0x1c0] sm:$0xff]  ;;  %v72_v34 = vld [vmem:[%s896_s0 + $0x1d0] sm:$0xff] }
  0x23   :  { %318 = vst [vmem:[%s899_s3 + $0x110] sm:$0xff] %v254_v35  ;;  %319 = vst [vmem:[%s899_s3 + $0x118] sm:$0xff] %v255_v36  ;;  %v259_v46 = vmax.f32 %v195_v37, 0.0  ;;  %v127_v48 = vmul.f32 %v380_v1, %v56_v32  ;;  %v128_v49 = vmul.f32 %v380_v1, %v57_v33  ;;  %v196_v50 = vadd.f32 %v385_v2, %v125_v44  ;;  %v71_v33 = vld [vmem:[%s896_s0 + $0x1c8] sm:$0xff]  ;;  %v73_v35 = vld [vmem:[%s896_s0 + $0x1d8] sm:$0xff] }
  0x24   :  { %320 = vst [vmem:[%s899_s3 + $0x120] sm:$0xff] %v256_v41  ;;  %321 = vst [vmem:[%s899_s3 + $0x128] sm:$0xff] %v257_v42  ;;  %v129_v51 = vmul.f32 %v380_v1, %v58_v38  ;;  %v130_v52 = vmul.f32 %v380_v1, %v59_v39  ;;  %v131_v53 = vmul.f32 %v380_v1, %v60_v40  ;;  %v74_v40 = vld [vmem:[%s896_s0 + $0x1e0] sm:$0xff]  ;;  %v75_v41 = vld [vmem:[%s896_s0 + $0x1e8] sm:$0xff] }
  0x25   :  { %322 = vst [vmem:[%s899_s3 + $0x130] sm:$0xff] %v258_v43  ;;  %323 = vst [vmem:[%s899_s3 + $0x138] sm:$0xff] %v259_v46  ;;  %v197_v54 = vadd.f32 %v385_v2, %v126_v47  ;;  %v198_v55 = vadd.f32 %v385_v2, %v127_v48  ;;  %v199_v56 = vadd.f32 %v385_v2, %v128_v49  ;;  %v260_v59 = vmax.f32 %v196_v50, 0.0  ;;  %v76_v42 = vld [vmem:[%s896_s0 + $0x1f0] sm:$0xff]  ;;  %v77_v47 = vld [vmem:[%s896_s0 + $0x1f8] sm:$0xff] }
  0x26   :  { %v132_v57 = vmul.f32 %v380_v1, %v61_v45  ;;  %v200_v60 = vadd.f32 %v385_v2, %v129_v51  ;;  %v201_v61 = vadd.f32 %v385_v2, %v130_v52  ;;  %v202_v62 = vadd.f32 %v385_v2, %v131_v53 }
  0x27   :  { %v261_v4 = vmax.f32 %v197_v54, 0.0  ;;  %v262_v5 = vmax.f32 %v198_v55, 0.0  ;;  %v263_v6 = vmax.f32 %v199_v56, 0.0  ;;  %324 = vst [vmem:[%s899_s3 + $0x140] sm:$0xff] %v260_v59  ;;  %v133_v14 = vmul.f32 %v380_v1, %v62_v58 }
  0x28   :  { %v203_v7 = vadd.f32 %v385_v2, %v132_v57  ;;  %v264_v11 = vmax.f32 %v200_v60, 0.0  ;;  %v265_v12 = vmax.f32 %v201_v61, 0.0  ;;  %v266_v13 = vmax.f32 %v202_v62, 0.0 }
  0x29   :  { %325 = vst [vmem:[%s899_s3 + $0x148] sm:$0xff] %v261_v4  ;;  %326 = vst [vmem:[%s899_s3 + $0x150] sm:$0xff] %v262_v5  ;;  %v134_v17 = vmul.f32 %v380_v1, %v63_v63  ;;  %v135_v18 = vmul.f32 %v380_v1, %v64_v0  ;;  %v136_v19 = vmul.f32 %v380_v1, %v65_v3 }
  0x2a   :  { %327 = vst [vmem:[%s899_s3 + $0x158] sm:$0xff] %v263_v6  ;;  %v267_v16 = vmax.f32 %v203_v7, 0.0  ;;  %328 = vst [vmem:[%s899_s3 + $0x160] sm:$0xff] %v264_v11  ;;  %v204_v20 = vadd.f32 %v385_v2, %v133_v14  ;;  %v137_v21 = vmul.f32 %v380_v1, %v66_v8  ;;  %v138_v22 = vmul.f32 %v380_v1, %v67_v9 }
  0x2b   :  { %329 = vst [vmem:[%s899_s3 + $0x168] sm:$0xff] %v265_v12  ;;  %330 = vst [vmem:[%s899_s3 + $0x170] sm:$0xff] %v266_v13  ;;  %v139_v23 = vmul.f32 %v380_v1, %v68_v10  ;;  %v205_v24 = vadd.f32 %v385_v2, %v134_v17  ;;  %v206_v25 = vadd.f32 %v385_v2, %v135_v18 }
  0x2c   :  { %331 = vst [vmem:[%s899_s3 + $0x178] sm:$0xff] %v267_v16  ;;  %v207_v26 = vadd.f32 %v385_v2, %v136_v19  ;;  %v140_v27 = vmul.f32 %v380_v1, %v69_v15  ;;  %v268_v29 = vmax.f32 %v204_v20, 0.0  ;;  %v208_v30 = vadd.f32 %v385_v2, %v137_v21 }
  0x2d   :  { %v209_v31 = vadd.f32 %v385_v2, %v138_v22  ;;  %v210_v32 = vadd.f32 %v385_v2, %v139_v23  ;;  %v269_v36 = vmax.f32 %v205_v24, 0.0  ;;  %v270_v37 = vmax.f32 %v206_v25, 0.0 }
  0x2e   :  { %v271_v38 = vmax.f32 %v207_v26, 0.0  ;;  %v211_v39 = vadd.f32 %v385_v2, %v140_v27  ;;  %332 = vst [vmem:[%s899_s3 + $0x180] sm:$0xff] %v268_v29  ;;  %v272_v43 = vmax.f32 %v208_v30, 0.0  ;;  %v141_v46 = vmul.f32 %v380_v1, %v70_v28 }
  0x2f   :  { %v273_v44 = vmax.f32 %v209_v31, 0.0  ;;  %v274_v45 = vmax.f32 %v210_v32, 0.0  ;;  %333 = vst [vmem:[%s899_s3 + $0x188] sm:$0xff] %v269_v36  ;;  %334 = vst [vmem:[%s899_s3 + $0x190] sm:$0xff] %v270_v37  ;;  %v142_v49 = vmul.f32 %v380_v1, %v71_v33  ;;  %v143_v50 = vmul.f32 %v380_v1, %v72_v34 }
  0x30   :  { %335 = vst [vmem:[%s899_s3 + $0x198] sm:$0xff] %v271_v38  ;;  %v275_v48 = vmax.f32 %v211_v39, 0.0  ;;  %v144_v51 = vmul.f32 %v380_v1, %v73_v35  ;;  %336 = vst [vmem:[%s899_s3 + $0x1a0] sm:$0xff] %v272_v43  ;;  %v212_v52 = vadd.f32 %v385_v2, %v141_v46  ;;  %v145_v53 = vmul.f32 %v380_v1, %v74_v40 }
  0x31   :  { %337 = vst [vmem:[%s899_s3 + $0x1a8] sm:$0xff] %v273_v44  ;;  %338 = vst [vmem:[%s899_s3 + $0x1b0] sm:$0xff] %v274_v45  ;;  %v146_v54 = vmul.f32 %v380_v1, %v75_v41  ;;  %v147_v55 = vmul.f32 %v380_v1, %v76_v42  ;;  %v213_v56 = vadd.f32 %v385_v2, %v142_v49 }
  0x32   :  { %339 = vst [vmem:[%s899_s3 + $0x1b8] sm:$0xff] %v275_v48  ;;  %v214_v57 = vadd.f32 %v385_v2, %v143_v50  ;;  %v215_v58 = vadd.f32 %v385_v2, %v144_v51  ;;  %v148_v59 = vmul.f32 %v380_v1, %v77_v47  ;;  %v276_v60 = vmax.f32 %v212_v52, 0.0 }
  0x33   :  { %v216_v61 = vadd.f32 %v385_v2, %v145_v53  ;;  %v217_v62 = vadd.f32 %v385_v2, %v146_v54  ;;  %v218_v63 = vadd.f32 %v385_v2, %v147_v55  ;;  %v277_v0 = vmax.f32 %v213_v56, 0.0 }
  0x34   :  { %v278_v3 = vmax.f32 %v214_v57, 0.0  ;;  %v279_v4 = vmax.f32 %v215_v58, 0.0  ;;  %v219_v5 = vadd.f32 %v385_v2, %v148_v59  ;;  %340 = vst [vmem:[%s899_s3 + $0x1c0] sm:$0xff] %v276_v60 }
  0x35   :  { %v280_v6 = vmax.f32 %v216_v61, 0.0  ;;  %v281_v7 = vmax.f32 %v217_v62, 0.0  ;;  %v282_v8 = vmax.f32 %v218_v63, 0.0  ;;  %341 = vst [vmem:[%s899_s3 + $0x1c8] sm:$0xff] %v277_v0 }
  0x36   :  { %342 = vst [vmem:[%s899_s3 + $0x1d0] sm:$0xff] %v278_v3  ;;  %343 = vst [vmem:[%s899_s3 + $0x1d8] sm:$0xff] %v279_v4  ;;  %v283_v1 = vmax.f32 %v219_v5, 0.0 }
  0x37   :  { %344 = vst [vmem:[%s899_s3 + $0x1e0] sm:$0xff] %v280_v6  ;;  %345 = vst [vmem:[%s899_s3 + $0x1e8] sm:$0xff] %v281_v7 }
  0x38   :  { %346 = vst [vmem:[%s899_s3 + $0x1f0] sm:$0xff] %v282_v8  ;;  %347 = vst [vmem:[%s899_s3 + $0x1f8] sm:$0xff] %v283_v1 }

// kernel: conv_block_forward.2
= control target key start
LH: loop header
LB: loop body
LE: loop exit
PB: predicated region body
PF: predicated region fallthrough
CT: control target
= control target key end

     0   :  { %v1124_v61 = vmov 0.0   ;;  %vm889_vm0 = vcmask 1040384   ;;  %s1658_s1 = inlined_call_operand.vmem [shape: bf16[128,128], index: 1, kind: input, shape index: {}]   ;;  %s1659_s0 = inlined_call_operand.vmem [shape: bf16[512,128], index: 0, kind: input, shape index: {}]   ;;  %s1660_s2 = inlined_call_operand.vmem [shape: f32[512,128], index: 2, kind: output, shape index: {0}]   ;;  %s1661_s3 = inlined_call_operand.vmem [shape: f32[2,128], index: 3, kind: output, shape index: {1}]  }
   0x1   :  { %v1084_v0 = vld [vmem:[%s1658_s1] sm:$0xff]   ;;  %v1085_v1 = vld [vmem:[%s1658_s1 + $0x8] sm:$0xff]   ;;  %v1086_v2 = vld [vmem:[%s1658_s1 + $0x10] sm:$0xff]   ;;  %895 = vst [vmem:[%s1661_s3] sm:$0x3] %v1124_v61 }
   0x2   :  { %987 = vmatprep.subr.bf16.mxu0 %v1084_v0  ;;  %1067 = vmatprep.subr.bf16.mxu1 %v1084_v0  ;;  %v1087_v3 = vld [vmem:[%s1658_s1 + $0x18] sm:$0xff]   ;;  %v1092_v4 = vld [vmem:[%s1659_s0] sm:$0xff]   ;;  %v1089_v6 = vld [vmem:[%s1658_s1 + $0x28] sm:$0xff]  }
   0x3   :  { %988 = vmatpush3.bf16.msra.mxu0 %v1084_v0  ;;  %1075 = vmatpush3.bf16.msra.mxu1 %v1084_v0  ;;  %v1088_v5 = vld [vmem:[%s1658_s1 + $0x20] sm:$0xff]   ;;  %v1090_v7 = vld [vmem:[%s1658_s1 + $0x30] sm:$0xff]   ;;  %v1091_v8 = vld [vmem:[%s1658_s1 + $0x38] sm:$0xff]  }
   0x4   :  { %989 = vmatprep.subr.bf16.mxu0 %v1085_v1  ;;  %1068 = vmatprep.subr.bf16.mxu1 %v1085_v1  ;;  %v1108_v9 = vld [vmem:[%s1659_s0 + $0x80] sm:$0xff]   ;;  %v1093_v10 = vld [vmem:[%s1659_s0 + $0x8] sm:$0xff]   ;;  %v1094_v11 = vld [vmem:[%s1659_s0 + $0x10] sm:$0xff]  }
   0x5   :  { %1003 = vmatprep.mubr.bf16.mxu0 %v1092_v4  ;;  %1035 = vmatprep.mubr.bf16.mxu1 %v1108_v9  ;;  %v1109_v12 = vld [vmem:[%s1659_s0 + $0x88] sm:$0xff]   ;;  %v1110_v13 = vld [vmem:[%s1659_s0 + $0x90] sm:$0xff]   ;;  %v1095_v14 = vld [vmem:[%s1659_s0 + $0x18] sm:$0xff]  }
   0x6   :  { %v1096_v15 = vld [vmem:[%s1659_s0 + $0x20] sm:$0xff]   ;;  %v1111_v16 = vld [vmem:[%s1659_s0 + $0x98] sm:$0xff]   ;;  %v1097_v18 = vld [vmem:[%s1659_s0 + $0x28] sm:$0xff]  }
   0x7   :  { %990 = vmatpush3.bf16.msra.mxu0 %v1085_v1  ;;  %1076 = vmatpush3.bf16.msra.mxu1 %v1085_v1  ;;  %v1112_v17 = vld [vmem:[%s1659_s0 + $0xa0] sm:$0xff]   ;;  %v1113_v19 = vld [vmem:[%s1659_s0 + $0xa8] sm:$0xff]   ;;  %v1098_v20 = vld [vmem:[%s1659_s0 + $0x30] sm:$0xff]  }
   0x8   :  { %991 = vmatprep.subr.bf16.mxu0 %v1086_v2  ;;  %1069 = vmatprep.subr.bf16.mxu1 %v1086_v2  ;;  %v1114_v21 = vld [vmem:[%s1659_s0 + $0xb0] sm:$0xff]   ;;  %v1099_v22 = vld [vmem:[%s1659_s0 + $0x38] sm:$0xff]   ;;  %v1100_v24 = vld [vmem:[%s1659_s0 + $0x40] sm:$0xff]  }
   0x9   :  { %v1115_v23 = vld [vmem:[%s1659_s0 + $0xb8] sm:$0xff]   ;;  %v1116_v25 = vld [vmem:[%s1659_s0 + $0xc0] sm:$0xff]   ;;  %v1101_v26 = vld [vmem:[%s1659_s0 + $0x48] sm:$0xff]  }
   0xa   :  { %v1117_v27 = vld [vmem:[%s1659_s0 + $0xc8] sm:$0xff]   ;;  %v1102_v28 = vld [vmem:[%s1659_s0 + $0x50] sm:$0xff]   ;;  %v1103_v30 = vld [vmem:[%s1659_s0 + $0x58] sm:$0xff]  }
   0xb   :  { %992 = vmatpush3.bf16.msra.mxu0 %v1086_v2  ;;  %1077 = vmatpush3.bf16.msra.mxu1 %v1086_v2  ;;  %v1118_v29 = vld [vmem:[%s1659_s0 + $0xd0] sm:$0xff]   ;;  %v1119_v31 = vld [vmem:[%s1659_s0 + $0xd8] sm:$0xff]   ;;  %v1104_v32 = vld [vmem:[%s1659_s0 + $0x60] sm:$0xff]  }
   0xc   :  { %993 = vmatprep.subr.bf16.mxu0 %v1087_v3  ;;  %1070 = vmatprep.subr.bf16.mxu1 %v1087_v3  ;;  %v1120_v33 = vld [vmem:[%s1659_s0 + $0xe0] sm:$0xff]   ;;  %v1105_v34 = vld [vmem:[%s1659_s0 + $0x68] sm:$0xff]   ;;  %v1106_v36 = vld [vmem:[%s1659_s0 + $0x70] sm:$0xff]  }
   0xd   :  { %v1121_v35 = vld [vmem:[%s1659_s0 + $0xe8] sm:$0xff]   ;;  %v1122_v37 = vld [vmem:[%s1659_s0 + $0xf0] sm:$0xff]   ;;  %v1107_v38 = vld [vmem:[%s1659_s0 + $0x78] sm:$0xff]  }
   0xe   :  { %v1123_v39 = vld [vmem:[%s1659_s0 + $0xf8] sm:$0xff]  }
   0xf   :  { %994 = vmatpush3.bf16.msra.mxu0 %v1087_v3  ;;  %1078 = vmatpush3.bf16.msra.mxu1 %v1087_v3 }
  0x10   :  { %995 = vmatprep.subr.bf16.mxu0 %v1088_v5  ;;  %1071 = vmatprep.subr.bf16.mxu1 %v1088_v5 }
  0x13   :  { %996 = vmatpush3.bf16.msra.mxu0 %v1088_v5  ;;  %1079 = vmatpush3.bf16.msra.mxu1 %v1088_v5 }
  0x14   :  { %997 = vmatprep.subr.bf16.mxu0 %v1089_v6  ;;  %1072 = vmatprep.subr.bf16.mxu1 %v1089_v6 }
  0x17   :  { %998 = vmatpush3.bf16.msra.mxu0 %v1089_v6  ;;  %1080 = vmatpush3.bf16.msra.mxu1 %v1089_v6 }
  0x18   :  { %999 = vmatprep.subr.bf16.mxu0 %v1090_v7  ;;  %1073 = vmatprep.subr.bf16.mxu1 %v1090_v7 }
  0x1b   :  { %1000 = vmatpush3.bf16.msra.mxu0 %v1090_v7  ;;  %1081 = vmatpush3.bf16.msra.mxu1 %v1090_v7 }
  0x1c   :  { %1001 = vmatprep.subr.bf16.mxu0 %v1091_v8  ;;  %1074 = vmatprep.subr.bf16.mxu1 %v1091_v8 }
  0x1f   :  { %1002 = vmatpush3.bf16.msra.mxu0 %v1091_v8  ;;  %1082 = vmatpush3.bf16.msra.mxu1 %v1091_v8 }
  0x22   :  { %1004 = vmatmul.mubr.bf16.vlgmr.msra.gmra.mrb[0].mxu0 %v1093_v10  ;;  %1036 = vmatmul.mubr.bf16.vlgmr.msra.gmra.mrb[0].mxu1 %v1109_v12 }
  0x23   :  { %1007 = vmatprep.mubr.bf16.mxu0 %v1094_v11  ;;  %1039 = vmatprep.mubr.bf16.mxu1 %v1110_v13 }
  0x2a   :  { %1008 = vmatmul.mubr.bf16.gmra.mrb[4].mxu0 %v1095_v14  ;;  %1040 = vmatmul.mubr.bf16.gmra.mrb[4].mxu1 %v1111_v16 }
  0x2b   :  { %1011 = vmatprep.mubr.bf16.mxu0 %v1096_v15  ;;  %1043 = vmatprep.mubr.bf16.mxu1 %v1112_v17 }
  0x32   :  { %1012 = vmatmul.mubr.bf16.gmra.mrb[8].mxu0 %v1097_v18  ;;  %1044 = vmatmul.mubr.bf16.gmra.mrb[8].mxu1 %v1113_v19 }
  0x33   :  { %1015 = vmatprep.mubr.bf16.mxu0 %v1098_v20  ;;  %1047 = vmatprep.mubr.bf16.mxu1 %v1114_v21 }
  0x3a   :  { %1016 = vmatmul.mubr.bf16.gmra.mrb[12].mxu0 %v1099_v22  ;;  %1048 = vmatmul.mubr.bf16.gmra.mrb[12].mxu1 %v1115_v23 }
  0x3b   :  { %1019 = vmatprep.mubr.bf16.mxu0 %v1100_v24  ;;  %1051 = vmatprep.mubr.bf16.mxu1 %v1116_v25 }
  0x42   :  { %1020 = vmatmul.mubr.bf16.gmra.mrb[16].mxu0 %v1101_v26  ;;  %1052 = vmatmul.mubr.bf16.gmra.mrb[16].mxu1 %v1117_v27 }
  0x43   :  { %1023 = vmatprep.mubr.bf16.mxu0 %v1102_v28  ;;  %1055 = vmatprep.mubr.bf16.mxu1 %v1118_v29 }
  0x4a   :  { %1024 = vmatmul.mubr.bf16.gmra.mrb[20].mxu0 %v1103_v30  ;;  %1056 = vmatmul.mubr.bf16.gmra.mrb[20].mxu1 %v1119_v31 }
  0x4b   :  { %1027 = vmatprep.mubr.bf16.mxu0 %v1104_v32  ;;  %1059 = vmatprep.mubr.bf16.mxu1 %v1120_v33 }
  0x52   :  { %1028 = vmatmul.mubr.bf16.gmra.mrb[24].mxu0 %v1105_v34  ;;  %1060 = vmatmul.mubr.bf16.gmra.mrb[24].mxu1 %v1121_v35 }
  0x53   :  { %1031 = vmatprep.mubr.bf16.mxu0 %v1106_v36  ;;  %1063 = vmatprep.mubr.bf16.mxu1 %v1122_v37 }
  0x5a   :  { %1032 = vmatmul.mubr.bf16.gmra.mrb[28].mxu0 %v1107_v38  ;;  %1064 = vmatmul.mubr.bf16.gmra.mrb[28].mxu1 %v1123_v39 }
  0xf5   :  { %v1005_v40 = vpop.f32.mrb[0].mxu0  ;;  %v1265_v41 = vpop.f32.mrb[0].mxu1 }
  0xf6   :  { %625 = vst [vmem:[%s1660_s2 + $0x10] sm:$0xff] %v1005_v40  ;;  %v368_v42 = vpop.f32.mrb[1].mxu0  ;;  %657 = vst [vmem:[%s1660_s2 + $0x110] sm:$0xff] %v1265_v41  ;;  %v1274_v43 = vpop.f32.mrb[1].mxu1  ;;  %v758_v51 = vmul.f32 %v1005_v40, %v1005_v40 }
  0xf7   :  { %623 = vst [vmem:[%s1660_s2] sm:$0xff] %v368_v42  ;;  %v1006_v44 = vpop.f32.mrb[2].mxu0  ;;  %655 = vst [vmem:[%s1660_s2 + $0x100] sm:$0xff] %v1274_v43  ;;  %v1283_v45 = vpop.f32.mrb[2].mxu1  ;;  %v756_v48 = vmul.f32 %v368_v42, %v368_v42 }
  0xf8   :  { %626 = vst [vmem:[%s1660_s2 + $0x18] sm:$0xff] %v1006_v44  ;;  %v371_v46 = vpop.f32.mrb[3].mxu0  ;;  %658 = vst [vmem:[%s1660_s2 + $0x118] sm:$0xff] %v1283_v45  ;;  %v1292_v47 = vpop.f32.mrb[3].mxu1  ;;  %v759_v54 = vmul.f32 %v1006_v44, %v1006_v44 }
  0xf9   :  { %624 = vst [vmem:[%s1660_s2 + $0x8] sm:$0xff] %v371_v46  ;;  %v687_v49 = vadd.f32 %v371_v46, %v368_v42  ;;  %v757_v50 = vmul.f32 %v371_v46, %v371_v46  ;;  %656 = vst [vmem:[%s1660_s2 + $0x108] sm:$0xff] %v1292_v47 }
  0xfb   :  { %v688_v52 = vadd.f32 %v1005_v40, %v687_v49  ;;  %v820_v53 = vadd.f32 %v757_v50, %v756_v48 }
  0xfd   :  { %v821_v55 = vadd.f32 %v820_v53, %v758_v51  ;;  %v1009_v56 = vpop.f32.mrb[4].mxu0  ;;  %v689_v57 = vadd.f32 %v1006_v44, %v688_v52  ;;  %v1301_v58 = vpop.f32.mrb[4].mxu1 }
  0xfe   :  { %629 = vst [vmem:[%s1660_s2 + $0x30] sm:$0xff] %v1009_v56  ;;  %v384_v59 = vpop.f32.mrb[5].mxu0  ;;  %661 = vst [vmem:[%s1660_s2 + $0x130] sm:$0xff] %v1301_v58  ;;  %v1310_v60 = vpop.f32.mrb[5].mxu1  ;;  %v762_v8 = vmul.f32 %v1009_v56, %v1009_v56 }
  0xff   :  { %627 = vst [vmem:[%s1660_s2 + $0x20] sm:$0xff] %v384_v59  ;;  %v690_v62 = vadd.f32 %v689_v57, %v384_v59  ;;  %v760_v63 = vmul.f32 %v384_v59, %v384_v59  ;;  %v822_v0 = vadd.f32 %v821_v55, %v759_v54  ;;  %v1010_v1 = vpop.f32.mrb[6].mxu0  ;;  %659 = vst [vmem:[%s1660_s2 + $0x120] sm:$0xff] %v1310_v60  ;;  %v1322_v2 = vpop.f32.mrb[6].mxu1 }
 0x100   :  { %630 = vst [vmem:[%s1660_s2 + $0x38] sm:$0xff] %v1010_v1  ;;  %v387_v3 = vpop.f32.mrb[7].mxu0  ;;  %662 = vst [vmem:[%s1660_s2 + $0x138] sm:$0xff] %v1322_v2  ;;  %v1331_v4 = vpop.f32.mrb[7].mxu1  ;;  %v763_v11 = vmul.f32 %v1010_v1, %v1010_v1 }
 0x101   :  { %v823_v5 = vadd.f32 %v822_v0, %v760_v63  ;;  %628 = vst [vmem:[%s1660_s2 + $0x28] sm:$0xff] %v387_v3  ;;  %v691_v6 = vadd.f32 %v690_v62, %v387_v3  ;;  %v761_v7 = vmul.f32 %v387_v3, %v387_v3  ;;  %660 = vst [vmem:[%s1660_s2 + $0x128] sm:$0xff] %v1331_v4 }
 0x103   :  { %v692_v9 = vadd.f32 %v1009_v56, %v691_v6  ;;  %v824_v10 = vadd.f32 %v823_v5, %v761_v7 }
 0x105   :  { %v825_v12 = vadd.f32 %v824_v10, %v762_v8  ;;  %v1013_v13 = vpop.f32.mrb[8].mxu0  ;;  %v693_v14 = vadd.f32 %v1010_v1, %v692_v9  ;;  %v1340_v15 = vpop.f32.mrb[8].mxu1 }
 0x106   :  { %633 = vst [vmem:[%s1660_s2 + $0x50] sm:$0xff] %v1013_v13  ;;  %v400_v16 = vpop.f32.mrb[9].mxu0  ;;  %665 = vst [vmem:[%s1660_s2 + $0x150] sm:$0xff] %v1340_v15  ;;  %v1349_v17 = vpop.f32.mrb[9].mxu1  ;;  %v766_v28 = vmul.f32 %v1013_v13, %v1013_v13 }
 0x107   :  { %631 = vst [vmem:[%s1660_s2 + $0x40] sm:$0xff] %v400_v16  ;;  %v694_v18 = vadd.f32 %v693_v14, %v400_v16  ;;  %v764_v19 = vmul.f32 %v400_v16, %v400_v16  ;;  %v826_v20 = vadd.f32 %v825_v12, %v763_v11  ;;  %v1014_v21 = vpop.f32.mrb[10].mxu0  ;;  %663 = vst [vmem:[%s1660_s2 + $0x140] sm:$0xff] %v1349_v17  ;;  %v1358_v22 = vpop.f32.mrb[10].mxu1 }
 0x108   :  { %634 = vst [vmem:[%s1660_s2 + $0x58] sm:$0xff] %v1014_v21  ;;  %v403_v23 = vpop.f32.mrb[11].mxu0  ;;  %666 = vst [vmem:[%s1660_s2 + $0x158] sm:$0xff] %v1358_v22  ;;  %v1367_v24 = vpop.f32.mrb[11].mxu1  ;;  %v767_v31 = vmul.f32 %v1014_v21, %v1014_v21 }
 0x109   :  { %v827_v25 = vadd.f32 %v826_v20, %v764_v19  ;;  %632 = vst [vmem:[%s1660_s2 + $0x48] sm:$0xff] %v403_v23  ;;  %v695_v26 = vadd.f32 %v694_v18, %v403_v23  ;;  %v765_v27 = vmul.f32 %v403_v23, %v403_v23  ;;  %664 = vst [vmem:[%s1660_s2 + $0x148] sm:$0xff] %v1367_v24 }
 0x10b   :  { %v696_v29 = vadd.f32 %v1013_v13, %v695_v26  ;;  %v828_v30 = vadd.f32 %v827_v25, %v765_v27 }
 0x10d   :  { %v829_v32 = vadd.f32 %v828_v30, %v766_v28  ;;  %v1017_v33 = vpop.f32.mrb[12].mxu0  ;;  %v697_v34 = vadd.f32 %v1014_v21, %v696_v29  ;;  %v1376_v35 = vpop.f32.mrb[12].mxu1 }
 0x10e   :  { %637 = vst [vmem:[%s1660_s2 + $0x70] sm:$0xff] %v1017_v33  ;;  %v416_v36 = vpop.f32.mrb[13].mxu0  ;;  %669 = vst [vmem:[%s1660_s2 + $0x170] sm:$0xff] %v1376_v35  ;;  %v1385_v37 = vpop.f32.mrb[13].mxu1  ;;  %v770_v52 = vmul.f32 %v1017_v33, %v1017_v33 }
 0x10f   :  { %635 = vst [vmem:[%s1660_s2 + $0x60] sm:$0xff] %v416_v36  ;;  %v698_v38 = vadd.f32 %v697_v34, %v416_v36  ;;  %v768_v39 = vmul.f32 %v416_v36, %v416_v36  ;;  %v830_v40 = vadd.f32 %v829_v32, %v767_v31  ;;  %v1018_v42 = vpop.f32.mrb[14].mxu0  ;;  %667 = vst [vmem:[%s1660_s2 + $0x160] sm:$0xff] %v1385_v37  ;;  %v1394_v44 = vpop.f32.mrb[14].mxu1 }
 0x110   :  { %638 = vst [vmem:[%s1660_s2 + $0x78] sm:$0xff] %v1018_v42  ;;  %v419_v46 = vpop.f32.mrb[15].mxu0  ;;  %670 = vst [vmem:[%s1660_s2 + $0x178] sm:$0xff] %v1394_v44  ;;  %v1403_v48 = vpop.f32.mrb[15].mxu1  ;;  %v771_v55 = vmul.f32 %v1018_v42, %v1018_v42 }
 0x111   :  { %v831_v49 = vadd.f32 %v830_v40, %v768_v39  ;;  %636 = vst [vmem:[%s1660_s2 + $0x68] sm:$0xff] %v419_v46  ;;  %v699_v50 = vadd.f32 %v698_v38, %v419_v46  ;;  %v769_v51 = vmul.f32 %v419_v46, %v419_v46  ;;  %668 = vst [vmem:[%s1660_s2 + $0x168] sm:$0xff] %v1403_v48 }
 0x113   :  { %v700_v53 = vadd.f32 %v1017_v33, %v699_v50  ;;  %v832_v54 = vadd.f32 %v831_v49, %v769_v51 }
 0x115   :  { %v833_v56 = vadd.f32 %v832_v54, %v770_v52  ;;  %v1021_v57 = vpop.f32.mrb[16].mxu0  ;;  %v701_v59 = vadd.f32 %v1018_v42, %v700_v53  ;;  %v1412_v61 = vpop.f32.mrb[16].mxu1 }
 0x116   :  { %641 = vst [vmem:[%s1660_s2 + $0x90] sm:$0xff] %v1021_v57  ;;  %v432_v62 = vpop.f32.mrb[17].mxu0  ;;  %673 = vst [vmem:[%s1660_s2 + $0x190] sm:$0xff] %v1412_v61  ;;  %v1421_v63 = vpop.f32.mrb[17].mxu1  ;;  %v774_v12 = vmul.f32 %v1021_v57, %v1021_v57 }
 0x117   :  { %639 = vst [vmem:[%s1660_s2 + $0x80] sm:$0xff] %v432_v62  ;;  %v702_v0 = vadd.f32 %v701_v59, %v432_v62  ;;  %v772_v1 = vmul.f32 %v432_v62, %v432_v62  ;;  %v834_v3 = vadd.f32 %v833_v56, %v771_v55  ;;  %v1022_v5 = vpop.f32.mrb[18].mxu0  ;;  %671 = vst [vmem:[%s1660_s2 + $0x180] sm:$0xff] %v1421_v63  ;;  %v1430_v6 = vpop.f32.mrb[18].mxu1 }
 0x118   :  { %642 = vst [vmem:[%s1660_s2 + $0x98] sm:$0xff] %v1022_v5  ;;  %v435_v7 = vpop.f32.mrb[19].mxu0  ;;  %674 = vst [vmem:[%s1660_s2 + $0x198] sm:$0xff] %v1430_v6  ;;  %v1439_v8 = vpop.f32.mrb[19].mxu1  ;;  %v775_v16 = vmul.f32 %v1022_v5, %v1022_v5 }
 0x119   :  { %v835_v9 = vadd.f32 %v834_v3, %v772_v1  ;;  %640 = vst [vmem:[%s1660_s2 + $0x88] sm:$0xff] %v435_v7  ;;  %v703_v10 = vadd.f32 %v702_v0, %v435_v7  ;;  %v773_v11 = vmul.f32 %v435_v7, %v435_v7  ;;  %672 = vst [vmem:[%s1660_s2 + $0x188] sm:$0xff] %v1439_v8 }
 0x11b   :  { %v704_v13 = vadd.f32 %v1021_v57, %v703_v10  ;;  %v836_v14 = vadd.f32 %v835_v9, %v773_v11 }
 0x11d   :  { %v837_v18 = vadd.f32 %v836_v14, %v774_v12  ;;  %v1025_v19 = vpop.f32.mrb[20].mxu0  ;;  %v705_v20 = vadd.f32 %v1022_v5, %v704_v13  ;;  %v1448_v21 = vpop.f32.mrb[20].mxu1 }
 0x11e   :  { %645 = vst [vmem:[%s1660_s2 + $0xb0] sm:$0xff] %v1025_v19  ;;  %v448_v23 = vpop.f32.mrb[21].mxu0  ;;  %677 = vst [vmem:[%s1660_s2 + $0x1b0] sm:$0xff] %v1448_v21  ;;  %v1457_v25 = vpop.f32.mrb[21].mxu1  ;;  %v778_v38 = vmul.f32 %v1025_v19, %v1025_v19 }
 0x11f   :  { %643 = vst [vmem:[%s1660_s2 + $0xa0] sm:$0xff] %v448_v23  ;;  %v706_v26 = vadd.f32 %v705_v20, %v448_v23  ;;  %v776_v27 = vmul.f32 %v448_v23, %v448_v23  ;;  %v838_v28 = vadd.f32 %v837_v18, %v775_v16  ;;  %v1026_v29 = vpop.f32.mrb[22].mxu0  ;;  %675 = vst [vmem:[%s1660_s2 + $0x1a0] sm:$0xff] %v1457_v25  ;;  %v1466_v30 = vpop.f32.mrb[22].mxu1 }
 0x120   :  { %646 = vst [vmem:[%s1660_s2 + $0xb8] sm:$0xff] %v1026_v29  ;;  %v451_v31 = vpop.f32.mrb[23].mxu0  ;;  %678 = vst [vmem:[%s1660_s2 + $0x1b8] sm:$0xff] %v1466_v30  ;;  %v1475_v32 = vpop.f32.mrb[23].mxu1  ;;  %v779_v42 = vmul.f32 %v1026_v29, %v1026_v29 }
 0x121   :  { %v839_v33 = vadd.f32 %v838_v28, %v776_v27  ;;  %644 = vst [vmem:[%s1660_s2 + $0xa8] sm:$0xff] %v451_v31  ;;  %v707_v34 = vadd.f32 %v706_v26, %v451_v31  ;;  %v777_v36 = vmul.f32 %v451_v31, %v451_v31  ;;  %676 = vst [vmem:[%s1660_s2 + $0x1a8] sm:$0xff] %v1475_v32 }
 0x123   :  { %v708_v39 = vadd.f32 %v1025_v19, %v707_v34  ;;  %v840_v40 = vadd.f32 %v839_v33, %v777_v36 }
 0x125   :  { %v841_v46 = vadd.f32 %v840_v40, %v778_v38  ;;  %v1029_v49 = vpop.f32.mrb[24].mxu0  ;;  %v709_v50 = vadd.f32 %v1026_v29, %v708_v39  ;;  %v1484_v51 = vpop.f32.mrb[24].mxu1 }
 0x126   :  { %649 = vst [vmem:[%s1660_s2 + $0xd0] sm:$0xff] %v1029_v49  ;;  %v464_v52 = vpop.f32.mrb[25].mxu0  ;;  %681 = vst [vmem:[%s1660_s2 + $0x1d0] sm:$0xff] %v1484_v51  ;;  %v1493_v53 = vpop.f32.mrb[25].mxu1  ;;  %v782_v7 = vmul.f32 %v1029_v49, %v1029_v49 }
 0x127   :  { %647 = vst [vmem:[%s1660_s2 + $0xc0] sm:$0xff] %v464_v52  ;;  %v710_v54 = vadd.f32 %v709_v50, %v464_v52  ;;  %v780_v55 = vmul.f32 %v464_v52, %v464_v52  ;;  %v842_v56 = vadd.f32 %v841_v46, %v779_v42  ;;  %v1030_v57 = vpop.f32.mrb[26].mxu0  ;;  %679 = vst [vmem:[%s1660_s2 + $0x1c0] sm:$0xff] %v1493_v53  ;;  %v1502_v59 = vpop.f32.mrb[26].mxu1 }
 0x128   :  { %650 = vst [vmem:[%s1660_s2 + $0xd8] sm:$0xff] %v1030_v57  ;;  %v467_v62 = vpop.f32.mrb[27].mxu0  ;;  %682 = vst [vmem:[%s1660_s2 + $0x1d8] sm:$0xff] %v1502_v59  ;;  %v1511_v0 = vpop.f32.mrb[27].mxu1  ;;  %v783_v11 = vmul.f32 %v1030_v57, %v1030_v57  ;;  %v788_v50 = vmul.f32 %v1274_v43, %v1274_v43 }
 0x129   :  { %v843_v1 = vadd.f32 %v842_v56, %v780_v55  ;;  %648 = vst [vmem:[%s1660_s2 + $0xc8] sm:$0xff] %v467_v62  ;;  %v711_v3 = vadd.f32 %v710_v54, %v467_v62  ;;  %v781_v5 = vmul.f32 %v467_v62, %v467_v62  ;;  %680 = vst [vmem:[%s1660_s2 + $0x1c8] sm:$0xff] %v1511_v0 }
 0x12a   :  { %v790_v62 = vmul.f32 %v1265_v41, %v1265_v41 }
 0x12b   :  { %v712_v9 = vadd.f32 %v1029_v49, %v711_v3  ;;  %v844_v10 = vadd.f32 %v843_v1, %v781_v5  ;;  %v791_v5 = vmul.f32 %v1283_v45, %v1283_v45 }
 0x12d   :  { %v845_v12 = vadd.f32 %v844_v10, %v782_v7  ;;  %v1033_v13 = vpop.f32.mrb[28].mxu0  ;;  %v713_v14 = vadd.f32 %v1030_v57, %v712_v9  ;;  %v1520_v16 = vpop.f32.mrb[28].mxu1  ;;  %v789_v57 = vmul.f32 %v1292_v47, %v1292_v47 }
 0x12e   :  { %653 = vst [vmem:[%s1660_s2 + $0xf0] sm:$0xff] %v1033_v13  ;;  %v480_v18 = vpop.f32.mrb[29].mxu0  ;;  %685 = vst [vmem:[%s1660_s2 + $0x1f0] sm:$0xff] %v1520_v16  ;;  %v1529_v19 = vpop.f32.mrb[29].mxu1  ;;  %v786_v38 = vmul.f32 %v1033_v13, %v1033_v13 }
 0x12f   :  { %651 = vst [vmem:[%s1660_s2 + $0xe0] sm:$0xff] %v480_v18  ;;  %v714_v20 = vadd.f32 %v713_v14, %v480_v18  ;;  %v784_v23 = vmul.f32 %v480_v18, %v480_v18  ;;  %v846_v26 = vadd.f32 %v845_v12, %v783_v11  ;;  %v1034_v27 = vpop.f32.mrb[30].mxu0  ;;  %683 = vst [vmem:[%s1660_s2 + $0x1e0] sm:$0xff] %v1529_v19  ;;  %v1538_v28 = vpop.f32.mrb[30].mxu1 }
 0x130   :  { %654 = vst [vmem:[%s1660_s2 + $0xf8] sm:$0xff] %v1034_v27  ;;  %v483_v29 = vpop.f32.mrb[31].mxu0  ;;  %686 = vst [vmem:[%s1660_s2 + $0x1f8] sm:$0xff] %v1538_v28  ;;  %v1547_v31 = vpop.f32.mrb[31].mxu1  ;;  %v787_v42 = vmul.f32 %v1034_v27, %v1034_v27 }
 0x131   :  { %v847_v33 = vadd.f32 %v846_v26, %v784_v23  ;;  %652 = vst [vmem:[%s1660_s2 + $0xe8] sm:$0xff] %v483_v29  ;;  %v715_v34 = vadd.f32 %v714_v20, %v483_v29  ;;  %v785_v36 = vmul.f32 %v483_v29, %v483_v29  ;;  %684 = vst [vmem:[%s1660_s2 + $0x1e8] sm:$0xff] %v1547_v31 }
 0x133   :  { %v716_v39 = vadd.f32 %v1033_v13, %v715_v34  ;;  %v848_v40 = vadd.f32 %v847_v33, %v785_v36  ;;  %v793_v13 = vmul.f32 %v1331_v4, %v1331_v4  ;;  %v797_v33 = vmul.f32 %v1367_v24, %v1367_v24 }
 0x135   :  { %v849_v46 = vadd.f32 %v848_v40, %v786_v38  ;;  %v717_v49 = vadd.f32 %v1034_v27, %v716_v39 }
 0x137   :  { %v718_v52 = vadd.f32 %v717_v49, %v1274_v43  ;;  %v850_v54 = vadd.f32 %v849_v46, %v787_v42  ;;  %v792_v43 = vmul.f32 %v1310_v60, %v1310_v60  ;;  %v801_v49 = vmul.f32 %v1403_v48, %v1403_v48 }
 0x139   :  { %v851_v55 = vadd.f32 %v850_v54, %v788_v50  ;;  %v719_v56 = vadd.f32 %v718_v52, %v1292_v47 }
 0x13b   :  { %v720_v1 = vadd.f32 %v1265_v41, %v719_v56  ;;  %v852_v3 = vadd.f32 %v851_v55, %v789_v57  ;;  %v794_v41 = vmul.f32 %v1301_v58, %v1301_v58 }
 0x13d   :  { %v853_v7 = vadd.f32 %v852_v3, %v790_v62  ;;  %v721_v9 = vadd.f32 %v1283_v45, %v720_v1  ;;  %v795_v45 = vmul.f32 %v1322_v2, %v1322_v2  ;;  %v805_v1 = vmul.f32 %v1439_v8, %v1439_v8 }
 0x13f   :  { %v722_v10 = vadd.f32 %v721_v9, %v1310_v60  ;;  %v854_v11 = vadd.f32 %v853_v7, %v791_v5  ;;  %v796_v60 = vmul.f32 %v1349_v17, %v1349_v17 }
 0x141   :  { %v855_v12 = vadd.f32 %v854_v11, %v792_v43  ;;  %v723_v47 = vadd.f32 %v722_v10, %v1331_v4 }
 0x143   :  { %v724_v14 = vadd.f32 %v1301_v58, %v723_v47  ;;  %v856_v18 = vadd.f32 %v855_v12, %v793_v13  ;;  %v798_v58 = vmul.f32 %v1340_v15, %v1340_v15  ;;  %v809_v12 = vmul.f32 %v1475_v32, %v1475_v32 }
 0x145   :  { %v857_v20 = vadd.f32 %v856_v18, %v794_v41  ;;  %v725_v23 = vadd.f32 %v1322_v2, %v724_v14  ;;  %v799_v2 = vmul.f32 %v1358_v22, %v1358_v22 }
 0x147   :  { %v726_v26 = vadd.f32 %v725_v23, %v1349_v17  ;;  %v858_v27 = vadd.f32 %v857_v20, %v795_v45  ;;  %v800_v17 = vmul.f32 %v1385_v37, %v1385_v37  ;;  %v813_v23 = vmul.f32 %v1511_v0, %v1511_v0 }
 0x149   :  { %v859_v29 = vadd.f32 %v858_v27, %v796_v60  ;;  %v727_v4 = vadd.f32 %v726_v26, %v1367_v24 }
 0x14b   :  { %v728_v34 = vadd.f32 %v1340_v15, %v727_v4  ;;  %v860_v36 = vadd.f32 %v859_v29, %v797_v33  ;;  %v802_v15 = vmul.f32 %v1376_v35, %v1376_v35 }
 0x14d   :  { %v861_v38 = vadd.f32 %v860_v36, %v798_v58  ;;  %v729_v39 = vadd.f32 %v1358_v22, %v728_v34  ;;  %v803_v22 = vmul.f32 %v1394_v44, %v1394_v44  ;;  %v817_v34 = vmul.f32 %v1547_v31, %v1547_v31 }
 0x14f   :  { %v730_v40 = vadd.f32 %v729_v39, %v1385_v37  ;;  %v862_v42 = vadd.f32 %v861_v38, %v799_v2  ;;  %v804_v37 = vmul.f32 %v1421_v63, %v1421_v63 }
 0x151   :  { %v863_v46 = vadd.f32 %v862_v42, %v800_v17  ;;  %v731_v24 = vadd.f32 %v730_v40, %v1403_v48 }
 0x153   :  { %v732_v50 = vadd.f32 %v1376_v35, %v731_v24  ;;  %v864_v52 = vadd.f32 %v863_v46, %v801_v49  ;;  %v806_v35 = vmul.f32 %v1412_v61, %v1412_v61 }
 0x155   :  { %v865_v54 = vadd.f32 %v864_v52, %v802_v15  ;;  %v733_v55 = vadd.f32 %v1394_v44, %v732_v50  ;;  %v807_v44 = vmul.f32 %v1430_v6, %v1430_v6 }
 0x157   :  { %v734_v56 = vadd.f32 %v733_v55, %v1421_v63  ;;  %v866_v57 = vadd.f32 %v865_v54, %v803_v22  ;;  %v808_v63 = vmul.f32 %v1457_v25, %v1457_v25  ;;  %v896_v54 = vld [vmem:[%s1661_s3] sm:$0x3] }
 0x159   :  { %v867_v62 = vadd.f32 %v866_v57, %v804_v37  ;;  %v735_v48 = vadd.f32 %v734_v56, %v1439_v8 }
 0x15b   :  { %v736_v3 = vadd.f32 %v1412_v61, %v735_v48  ;;  %v868_v5 = vadd.f32 %v867_v62, %v805_v1  ;;  %v810_v61 = vmul.f32 %v1448_v21, %v1448_v21 }
 0x15d   :  { %v869_v7 = vadd.f32 %v868_v5, %v806_v35  ;;  %v737_v9 = vadd.f32 %v1430_v6, %v736_v3  ;;  %v811_v6 = vmul.f32 %v1466_v30, %v1466_v30 }
 0x15f   :  { %v738_v43 = vadd.f32 %v737_v9, %v1457_v25  ;;  %v870_v10 = vadd.f32 %v869_v7, %v807_v44  ;;  %v812_v25 = vmul.f32 %v1493_v53, %v1493_v53 }
 0x161   :  { %v871_v11 = vadd.f32 %v870_v10, %v808_v63  ;;  %v739_v8 = vadd.f32 %v738_v43, %v1475_v32 }
 0x163   :  { %v740_v47 = vadd.f32 %v1448_v21, %v739_v8  ;;  %v872_v13 = vadd.f32 %v871_v11, %v809_v12  ;;  %v814_v21 = vmul.f32 %v1484_v51, %v1484_v51 }
 0x165   :  { %v873_v41 = vadd.f32 %v872_v13, %v810_v61  ;;  %v741_v14 = vadd.f32 %v1466_v30, %v740_v47  ;;  %v815_v30 = vmul.f32 %v1502_v59, %v1502_v59 }
 0x167   :  { %v742_v18 = vadd.f32 %v741_v14, %v1493_v53  ;;  %v874_v45 = vadd.f32 %v873_v41, %v811_v6  ;;  %v816_v53 = vmul.f32 %v1529_v19, %v1529_v19 }
 0x169   :  { %v875_v20 = vadd.f32 %v874_v45, %v812_v25  ;;  %v743_v32 = vadd.f32 %v742_v18, %v1511_v0 }
 0x16b   :  { %v744_v60 = vadd.f32 %v1484_v51, %v743_v32  ;;  %v876_v26 = vadd.f32 %v875_v20, %v813_v23  ;;  %v818_v51 = vmul.f32 %v1520_v16, %v1520_v16 }
 0x16d   :  { %v877_v27 = vadd.f32 %v876_v26, %v814_v21  ;;  %v745_v29 = vadd.f32 %v1502_v59, %v744_v60  ;;  %v819_v59 = vmul.f32 %v1538_v28, %v1538_v28 }
 0x16f   :  { %v746_v4 = vadd.f32 %v745_v29, %v1529_v19  ;;  %v878_v33 = vadd.f32 %v877_v27, %v815_v30 }
 0x171   :  { %v879_v58 = vadd.f32 %v878_v33, %v816_v53  ;;  %v747_v0 = vadd.f32 %v746_v4, %v1547_v31 }
 0x173   :  { %v748_v36 = vadd.f32 %v1520_v16, %v747_v0  ;;  %v880_v2 = vadd.f32 %v879_v58, %v817_v34 }
 0x175   :  { %v749_v38 = vadd.f32 %v1538_v28, %v748_v36  ;;  %v881_v39 = vadd.f32 %v880_v2, %v818_v51 }
 0x177   :  { %v750_v19 = vrot.slane %v749_v38, 4  ;;  %v882_v17 = vadd.f32 %v881_v39, %v819_v59 }
 0x179   :  { %v751_v40 = vadd.f32 %v750_v19, %v749_v38  ;;  %v883_v42 = vrot.slane %v882_v17, 4 }
 0x17b   :  { %v752_v46 = vrot.slane %v751_v40, 2  ;;  %v884_v24 = vadd.f32 %v883_v42, %v882_v17 }
 0x17d   :  { %v753_v49 = vadd.f32 %v752_v46, %v751_v40  ;;  %v885_v31 = vrot.slane %v884_v24, 2 }
 0x17f   :  { %v754_v15 = vrot.slane %v753_v49, 1  ;;  %v886_v50 = vadd.f32 %v885_v31, %v884_v24 }
 0x181   :  { %v887_v52 = vrot.slane %v886_v50, 1  ;;  %v755_v16 = vadd.f32 %v754_v15, %v753_v49 }
 0x183   :  { %v888_v22 = vadd.f32 %v887_v52, %v886_v50 }
 0x185   :  { %v890_v28 = vsel %vm889_vm0, %v755_v16, %v888_v22 }
 0x186   :  { %v897_v55 = vadd.f32 %v896_v54, %v890_v28 }
 0x188   :  { %898 = vst [vmem:[%s1661_s3] sm:$0x3] %v897_v55 }

</bundles_post_ra>
